<compile_context>
chip_gen: v7x
topology: tpu7x:2x2x1
jax: 0.10.0
libtpu: 0.0.40
codegen_flags: <defaults>
</compile_context>

<pallas_src>
import functools

import jax
import jax.numpy as jnp
from jax.experimental import pallas as pl
from jax.experimental.pallas import tpu as pltpu


def _round_up(n: int, m: int) -> int:
    return ((n + m - 1) // m) * m


def _pick_row_tile(mp: int, tm_hint: int) -> int:
    """Largest tile in {512,256,128} (<= hint) dividing mp, preferring >=2 steps."""
    tm_hint = max(128, _round_up(int(tm_hint), 128))
    cands = [c for c in (512, 256, 128) if c <= tm_hint and mp % c == 0]
    if not cands:
        cands = [128]                       # mp is always a multiple of 128
    two_step = [c for c in cands if mp // c >= 2]   # keep both v7x cores busy
    return two_step[0] if two_step else cands[0]


def _pick_h4_chunk(h4p: int, cap: int = 1024) -> int:
    """Largest multiple of 128 <= cap that divides h4p."""
    for c in range(min(cap, h4p), 0, -128):
        if h4p % c == 0:
            return c
    return 128


def _vmem_capacity_bytes() -> int:
    try:
        return int(pltpu.get_tpu_info().vmem_capacity_bytes)
    except Exception:
        return 64 * 1024 * 1024             # conservative: v7x per-core VMEM


def _maybe_pad2d(a, rows, cols, dtype):
    """Cast + zero-pad a 2-D array to (rows, cols); pass through if already fits."""
    a = a.astype(dtype)
    if a.shape == (rows, cols):
        return a
    return jnp.zeros((rows, cols), dtype).at[:a.shape[0], :a.shape[1]].set(a)


def bert_interp_head_kernel(x_ref, w1_ref, b1_ref, w2_ref, b2_ref, o_ref, *,
                            n_chunks, chunk):
    # x_ref:  (tm, Hp)   row tile of the input, already in compute dtype.
    # w1_ref: (Hp, H4p)  dense weight (pre-transposed), resident in VMEM.
    # b1_ref: (1, H4p)   dense bias, f32.
    # w2_ref: (H4p, Dp)  project weight (pre-transposed), resident in VMEM.
    # b2_ref: (1, Dp)    project bias, f32.
    # o_ref:  (tm, Dp)   output row tile.
    x = x_ref[...]
    acc = jnp.zeros(o_ref.shape, jnp.float32)
    # Block the 4H dim so the full (tm, 4H) f32 intermediate never exists.
    for c in range(n_chunks):                     # static trip count (unrolled)
        lo = c * chunk
        h = jnp.dot(x, w1_ref[:, lo:lo + chunk],
                    preferred_element_type=jnp.float32)           # MXU
        h = jnp.maximum(h + b1_ref[:, lo:lo + chunk], 0.0)        # VPU, f32
        acc = acc + jnp.dot(h.astype(w2_ref.dtype),
                            w2_ref[lo:lo + chunk, :],
                            preferred_element_type=jnp.float32)   # MXU
    o_ref[...] = (acc + b2_ref[...]).astype(o_ref.dtype)


@functools.partial(jax.jit, static_argnames=("tm", "use_bf16"))
def bert_interp_head(x, w_dense, b_dense, w_project, b_project, *,
                     tm=512, use_bf16=True):
    """x: (M, hidden).  w_dense: (4H, H), b_dense: (4H,),
    w_project: (D_in, 4H), b_project: (D_in,)  -- PyTorch nn.Linear layout."""
    M, H = x.shape
    H4 = w_dense.shape[0]
    D_in = w_project.shape[0]

    # Lane-dense padding targets (multiples of 128 on every feature dim).
    Hp = _round_up(H, 128)
    H4p = _round_up(H4, 128)
    Dp = _round_up(D_in, 128)
    Mp = _round_up(M, 128)                  # pad rows only to 128, not to tm

    tm_eff = _pick_row_tile(Mp, tm)
    chunk = _pick_h4_chunk(H4p)
    n_chunks = H4p // chunk

    # use_bf16=False is a TEST-ONLY exactness path (multi-pass f32 MXU, 2x
    # weight VMEM).  Keep bf16 weights + f32 accumulation in production.
    cdt = jnp.bfloat16 if use_bf16 else x.dtype
    out_dtype = x.dtype

    # Weight/input prep: transpose + cast + pad only when the shape requires
    # it (standard BERT dims pass through with no extra HBM copy).  Folded by
    # XLA under jit; persist these device arrays for repeated serving calls.
    w1 = _maybe_pad2d(jnp.transpose(w_dense), Hp, H4p, cdt)
    w2 = _maybe_pad2d(jnp.transpose(w_project), H4p, Dp, cdt)
    b1 = _maybe_pad2d(b_dense.reshape(1, H4), 1, H4p, jnp.float32)
    b2 = _maybe_pad2d(b_project.reshape(1, D_in), 1, Dp, jnp.float32)
    xp = _maybe_pad2d(x, Mp, Hp, cdt)       # stream x in the compute dtype

    grid = (Mp // tm_eff,)

    xsize = jnp.dtype(cdt).itemsize
    wsize = jnp.dtype(cdt).itemsize
    osize = jnp.dtype(out_dtype).itemsize

    # VMEM budget: single-buffered weights + double-buffered x/out tiles +
    # f32 accumulator and one (tm, chunk) f32 intermediate + headroom,
    # clamped below the physical VMEM of whatever chip we are on.
    weight_bytes = (Hp * H4p + H4p * Dp) * wsize + (H4p + Dp) * 4
    stream_bytes = 2 * tm_eff * Hp * xsize + 2 * tm_eff * Dp * osize
    scratch_bytes = tm_eff * chunk * 4 + tm_eff * Dp * 4
    budget = weight_bytes + stream_bytes + scratch_bytes
    vmem_limit = budget + max(budget // 4, 4 * 1024 * 1024)
    vmem_limit = int(max(32 * 1024 * 1024,
                         min(vmem_limit, int(_vmem_capacity_bytes() * 0.85))))

    cost = pl.CostEstimate(
        flops=2 * Mp * (Hp * H4p + H4p * Dp),
        transcendentals=0,
        bytes_accessed=(Mp * Hp * xsize            # streamed x (compute dtype)
                        + Hp * H4p * wsize         # W1
                        + H4p * Dp * wsize         # W2
                        + (H4p + Dp) * 4           # biases
                        + Mp * Dp * osize),        # out
    )

    kernel = functools.partial(bert_interp_head_kernel,
                               n_chunks=n_chunks, chunk=chunk)

    # Constant block index -> a second pipeline buffer is pure VMEM waste.
    resident = pl.Buffered(1)

    out = pl.pallas_call(
        kernel,
        out_shape=jax.ShapeDtypeStruct((Mp, Dp), out_dtype),
        grid_spec=pltpu.PrefetchScalarGridSpec(
            num_scalar_prefetch=0,
            grid=grid,
            in_specs=[
                pl.BlockSpec((tm_eff, Hp), lambda i: (i, 0)),    # x row tile
                pl.BlockSpec((Hp, H4p), lambda i: (0, 0),
                             pipeline_mode=resident),            # W1 (resident)
                pl.BlockSpec((1, H4p), lambda i: (0, 0),
                             pipeline_mode=resident),            # b1
                pl.BlockSpec((H4p, Dp), lambda i: (0, 0),
                             pipeline_mode=resident),            # W2 (resident)
                pl.BlockSpec((1, Dp), lambda i: (0, 0),
                             pipeline_mode=resident),            # b2
            ],
            out_specs=pl.BlockSpec((tm_eff, Dp), lambda i: (i, 0)),
        ),
        compiler_params=pltpu.CompilerParams(
            dimension_semantics=("parallel",),    # row axis megacore-shardable
            vmem_limit_bytes=vmem_limit,
        ),
        cost_estimate=cost,
    )(xp, w1, b1, w2, b2)

    # Strip row / lane padding.
    return out[:M, :D_in]


if __name__ == "__main__":
    # Small shapes consistent with the module: first_token_tensor is
    # (batch, seq, hidden_dim); flatten leading dims onto rows.
    batch, seq = 2, 8
    hidden_dim = 32
    input_dim = 16  # output feature size of the head

    key = jax.random.PRNGKey(0)
    kx, kw1, kb1, kw2, kb2 = jax.random.split(key, 5)

    x = jax.random.normal(kx, (batch, seq, hidden_dim), dtype=jnp.float32)

    # Deterministic parameter init (PyTorch nn.Linear weight layout: (out, in)).
    w_dense = jax.random.normal(kw1, (4 * hidden_dim, hidden_dim),
                                dtype=jnp.float32) * 0.05
    b_dense = jax.random.normal(kb1, (4 * hidden_dim,), dtype=jnp.float32) * 0.05
    w_project = jax.random.normal(kw2, (input_dim, 4 * hidden_dim),
                                  dtype=jnp.float32) * 0.05
    b_project = jax.random.normal(kb2, (input_dim,), dtype=jnp.float32) * 0.05

    x2d = x.reshape(batch * seq, hidden_dim)
    out2d = bert_interp_head(x2d, w_dense, b_dense, w_project, b_project,
                             tm=512, use_bf16=True)
    out = out2d.reshape(batch, seq, input_dim)
    jax.block_until_ready(out)

    # Reference check in plain JAX (same math as the PyTorch module, f32).
    ref = jnp.maximum(x2d @ w_dense.T + b_dense, 0.0) @ w_project.T + b_project
    ref = ref.reshape(batch, seq, input_dim)
    assert out.shape == (batch, seq, input_dim)
    # bf16 weights/activations + f32 accumulation -> loosened tolerance.
    assert jnp.allclose(out, ref, atol=3e-2, rtol=3e-2), (
        float(jnp.max(jnp.abs(out - ref))))

    # Exactness path (f32 operands, test-only) should match more tightly.
    out_f32 = bert_interp_head(x2d, w_dense, b_dense, w_project, b_project,
                               tm=512, use_bf16=False).reshape(batch, seq,
                                                               input_dim)
    jax.block_until_ready(out_f32)
    assert jnp.allclose(out_f32, ref, atol=5e-3, rtol=5e-3), (
        float(jnp.max(jnp.abs(out_f32 - ref))))

    print("KERNEL_OK")
</pallas_src>

<mosaic_0001>
module attributes {stable_mosaic.version = 11 : i64} {
  func.func @bert_interp_head_kernel(%arg0: i32, %arg1: memref<128x128xbf16, #tpu.memory_space<vmem>>, %arg2: memref<128x128xbf16, #tpu.memory_space<vmem>>, %arg3: memref<1x128xf32, #tpu.memory_space<vmem>>, %arg4: memref<128x128xbf16, #tpu.memory_space<vmem>>, %arg5: memref<1x128xf32, #tpu.memory_space<vmem>>, %arg6: memref<128x128xf32, #tpu.memory_space<vmem>>) attributes {dimension_semantics = [#tpu.dimension_semantics<parallel>], iteration_bounds = array<i64: 1>, scalar_prefetch = 0 : i64, scratch_operands = 0 : i64, tpu.core_type = #tpu.core_type<tc>, window_params = [{transform_indices = @transform_0, window_bounds = array<i64: 128, 128>}, {pipeline_mode = #tpu.pipeline_mode<synchronous>, transform_indices = @transform_1, window_bounds = array<i64: 128, 128>}, {pipeline_mode = #tpu.pipeline_mode<synchronous>, transform_indices = @transform_2, window_bounds = array<i64: 1, 128>}, {pipeline_mode = #tpu.pipeline_mode<synchronous>, transform_indices = @transform_3, window_bounds = array<i64: 128, 128>}, {pipeline_mode = #tpu.pipeline_mode<synchronous>, transform_indices = @transform_4, window_bounds = array<i64: 1, 128>}, {transform_indices = @transform_5, window_bounds = array<i64: 128, 128>}]} {
    %c0 = arith.constant 0 : index
    %c0_0 = arith.constant 0 : index
    %0 = vector.load %arg1[%c0, %c0_0] : memref<128x128xbf16, #tpu.memory_space<vmem>>, vector<128x128xbf16>
    %cst = arith.constant 0.000000e+00 : f32
    %1 = vector.broadcast %cst : f32 to vector<128x128xf32>
    %c0_1 = arith.constant 0 : index
    %c0_2 = arith.constant 0 : index
    %2 = vector.load %arg2[%c0_1, %c0_2] : memref<128x128xbf16, #tpu.memory_space<vmem>>, vector<128x128xbf16>
    %cst_3 = arith.constant dense<0.000000e+00> : vector<128x128xf32>
    %3 = tpu.matmul %0, %2, %cst_3 {dimension_numbers = #tpu.dot_dimension_numbers<[1], [0], [0], [1], [0, 0, 1, 1], [], []>} : vector<128x128xbf16>, vector<128x128xbf16>, vector<128x128xf32> -> vector<128x128xf32>
    %c0_4 = arith.constant 0 : index
    %c0_5 = arith.constant 0 : index
    %4 = vector.load %arg3[%c0_4, %c0_5] : memref<1x128xf32, #tpu.memory_space<vmem>>, vector<1x128xf32>
    %5 = vector.broadcast %4 : vector<1x128xf32> to vector<128x128xf32>
    %6 = arith.addf %3, %5 : vector<128x128xf32>
    %cst_6 = arith.constant 0.000000e+00 : f32
    %7 = vector.broadcast %cst_6 : f32 to vector<128x128xf32>
    %8 = arith.maximumf %6, %7 : vector<128x128xf32>
    %9 = arith.truncf %8 : vector<128x128xf32> to vector<128x128xbf16>
    %c0_7 = arith.constant 0 : index
    %c0_8 = arith.constant 0 : index
    %10 = vector.load %arg4[%c0_7, %c0_8] : memref<128x128xbf16, #tpu.memory_space<vmem>>, vector<128x128xbf16>
    %cst_9 = arith.constant dense<0.000000e+00> : vector<128x128xf32>
    %11 = tpu.matmul %9, %10, %cst_9 {dimension_numbers = #tpu.dot_dimension_numbers<[1], [0], [0], [1], [0, 0, 1, 1], [], []>} : vector<128x128xbf16>, vector<128x128xbf16>, vector<128x128xf32> -> vector<128x128xf32>
    %12 = arith.addf %1, %11 : vector<128x128xf32>
    %c0_10 = arith.constant 0 : index
    %c0_11 = arith.constant 0 : index
    %13 = vector.load %arg5[%c0_10, %c0_11] : memref<1x128xf32, #tpu.memory_space<vmem>>, vector<1x128xf32>
    %14 = vector.broadcast %13 : vector<1x128xf32> to vector<128x128xf32>
    %15 = arith.addf %12, %14 : vector<128x128xf32>
    %c0_12 = arith.constant 0 : index
    %c0_13 = arith.constant 0 : index
    %16 = vector.load %arg6[%c0_12, %c0_13] : memref<128x128xf32, #tpu.memory_space<vmem>>, vector<128x128xf32>
    tpu.vector_store %arg6[%c0_12, %c0_13], %15 {strides = array<i32>} : memref<128x128xf32, #tpu.memory_space<vmem>>, vector<128x128xf32>,
    return
  }
  func.func @transform_0(%arg0: i32) -> (i32, i32) {
    %c0_i32 = arith.constant 0 : i32
    %c0_i32_0 = arith.constant 0 : i32
    return %arg0, %c0_i32 : i32, i32
  }
  func.func @transform_1(%arg0: i32) -> (i32, i32) {
    %c0_i32 = arith.constant 0 : i32
    %c0_i32_0 = arith.constant 0 : i32
    %c0_i32_1 = arith.constant 0 : i32
    return %c0_i32, %c0_i32_0 : i32, i32
  }
  func.func @transform_2(%arg0: i32) -> (i32, i32) {
    %c0_i32 = arith.constant 0 : i32
    %c0_i32_0 = arith.constant 0 : i32
    %c0_i32_1 = arith.constant 0 : i32
    return %c0_i32, %c0_i32_0 : i32, i32
  }
  func.func @transform_3(%arg0: i32) -> (i32, i32) {
    %c0_i32 = arith.constant 0 : i32
    %c0_i32_0 = arith.constant 0 : i32
    %c0_i32_1 = arith.constant 0 : i32
    return %c0_i32, %c0_i32_0 : i32, i32
  }
  func.func @transform_4(%arg0: i32) -> (i32, i32) {
    %c0_i32 = arith.constant 0 : i32
    %c0_i32_0 = arith.constant 0 : i32
    %c0_i32_1 = arith.constant 0 : i32
    return %c0_i32, %c0_i32_0 : i32, i32
  }
  func.func @transform_5(%arg0: i32) -> (i32, i32) {
    %c0_i32 = arith.constant 0 : i32
    %c0_i32_0 = arith.constant 0 : i32
    return %arg0, %c0_i32 : i32, i32
  }
}

</mosaic_0001>

<bundles_post_ra>
// kernel: bert_interp_head.1
= control target key start
LH: loop header
LB: loop body
LE: loop exit
PB: predicated region body
PF: predicated region fallthrough
CT: control target
= control target key end

     0   :  { %s767_s1 = inlined_call_operand.vmem [shape: bf16[128,128], index: 1, kind: input, shape index: {}]   ;;  %s768_s0 = inlined_call_operand.vmem [shape: bf16[128,128], index: 0, kind: input, shape index: {}]   ;;  %s769_s3 = inlined_call_operand.vmem [shape: bf16[128,128], index: 3, kind: input, shape index: {}]   ;;  %s770_s2 = inlined_call_operand.vmem [shape: f32[1,128], index: 2, kind: input, shape index: {}]   ;;  %s771_s4 = inlined_call_operand.vmem [shape: f32[1,128], index: 4, kind: input, shape index: {}]   ;;  %s772_s5 = inlined_call_operand.vmem [shape: f32[128,128], index: 5, kind: output, shape index: {}]  }
   0x1   :  { %v587_v0 = vld [vmem:[%s767_s1] sm:$0xff]   ;;  %v588_v1 = vld [vmem:[%s767_s1 + $0x8] sm:$0xff]   ;;  %v589_v2 = vld [vmem:[%s767_s1 + $0x10] sm:$0xff]  }
   0x2   :  { %523 = vmatprep.subr.bf16.mxu0 %v587_v0  ;;  %v590_v3 = vld [vmem:[%s767_s1 + $0x18] sm:$0xff]   ;;  %v595_v4 = vld [vmem:[%s768_s0] sm:$0xff]   ;;  %v592_v6 = vld [vmem:[%s767_s1 + $0x28] sm:$0xff]  }
   0x3   :  { %524 = vmatpush3.bf16.msra.mxu0 %v587_v0  ;;  %539 = vmatprep.mubr.bf16.mxu0 %v595_v4  ;;  %v591_v5 = vld [vmem:[%s767_s1 + $0x20] sm:$0xff]   ;;  %v604_v8 = vld [vmem:[%s769_s3 + $0x8] sm:$0xff]   ;;  %v593_v9 = vld [vmem:[%s767_s1 + $0x30] sm:$0xff]  }
   0x4   :  { %525 = vmatprep.subr.bf16.mxu0 %v588_v1  ;;  %v603_v7 = vld [vmem:[%s769_s3] sm:$0xff]   ;;  %v605_v10 = vld [vmem:[%s769_s3 + $0x10] sm:$0xff]   ;;  %v594_v11 = vld [vmem:[%s767_s1 + $0x38] sm:$0xff]  }
   0x5   :  { %555 = vmatprep.subr.bf16.mxu1 %v603_v7  ;;  %v606_v12 = vld [vmem:[%s769_s3 + $0x18] sm:$0xff]   ;;  %v607_v13 = vld [vmem:[%s769_s3 + $0x20] sm:$0xff]   ;;  %v596_v14 = vld [vmem:[%s768_s0 + $0x8] sm:$0xff]  }
   0x6   :  { %556 = vmatpush3.bf16.msra.mxu1 %v603_v7  ;;  %v597_v15 = vld [vmem:[%s768_s0 + $0x10] sm:$0xff]   ;;  %v608_v16 = vld [vmem:[%s769_s3 + $0x28] sm:$0xff]   ;;  %v598_v17 = vld [vmem:[%s768_s0 + $0x18] sm:$0xff]  }
   0x7   :  { %526 = vmatpush3.bf16.msra.mxu0 %v588_v1  ;;  %557 = vmatprep.subr.bf16.mxu1 %v604_v8  ;;  %v599_v18 = vld [vmem:[%s768_s0 + $0x20] sm:$0xff]   ;;  %v600_v19 = vld [vmem:[%s768_s0 + $0x28] sm:$0xff]   ;;  %v601_v20 = vld [vmem:[%s768_s0 + $0x30] sm:$0xff]  }
   0x8   :  { %527 = vmatprep.subr.bf16.mxu0 %v589_v2  ;;  %v602_v21 = vld [vmem:[%s768_s0 + $0x38] sm:$0xff]   ;;  %v609_v22 = vld [vmem:[%s769_s3 + $0x30] sm:$0xff]   ;;  %v465_v24 = vld [vmem:[%s770_s2] ss:$0 sm:$0xff] }
   0x9   :  { %v610_v23 = vld [vmem:[%s769_s3 + $0x38] sm:$0xff]  }
   0xa   :  { %558 = vmatpush3.bf16.msra.mxu1 %v604_v8 }
   0xb   :  { %528 = vmatpush3.bf16.msra.mxu0 %v589_v2  ;;  %559 = vmatprep.subr.bf16.mxu1 %v605_v10 }
   0xc   :  { %529 = vmatprep.subr.bf16.mxu0 %v590_v3 }
   0xe   :  { %560 = vmatpush3.bf16.msra.mxu1 %v605_v10 }
   0xf   :  { %530 = vmatpush3.bf16.msra.mxu0 %v590_v3  ;;  %561 = vmatprep.subr.bf16.mxu1 %v606_v12 }
  0x10   :  { %531 = vmatprep.subr.bf16.mxu0 %v591_v5 }
  0x12   :  { %562 = vmatpush3.bf16.msra.mxu1 %v606_v12 }
  0x13   :  { %532 = vmatpush3.bf16.msra.mxu0 %v591_v5  ;;  %563 = vmatprep.subr.bf16.mxu1 %v607_v13 }
  0x14   :  { %533 = vmatprep.subr.bf16.mxu0 %v592_v6 }
  0x16   :  { %564 = vmatpush3.bf16.msra.mxu1 %v607_v13 }
  0x17   :  { %534 = vmatpush3.bf16.msra.mxu0 %v592_v6  ;;  %565 = vmatprep.subr.bf16.mxu1 %v608_v16 }
  0x18   :  { %535 = vmatprep.subr.bf16.mxu0 %v593_v9 }
  0x1a   :  { %566 = vmatpush3.bf16.msra.mxu1 %v608_v16 }
  0x1b   :  { %536 = vmatpush3.bf16.msra.mxu0 %v593_v9  ;;  %567 = vmatprep.subr.bf16.mxu1 %v609_v22 }
  0x1c   :  { %537 = vmatprep.subr.bf16.mxu0 %v594_v11 }
  0x1e   :  { %568 = vmatpush3.bf16.msra.mxu1 %v609_v22 }
  0x1f   :  { %538 = vmatpush3.bf16.msra.mxu0 %v594_v11  ;;  %569 = vmatprep.subr.bf16.mxu1 %v610_v23 }
  0x22   :  { %540 = vmatmul.mubr.bf16.vlgmr.msra.gmra.mrb[0].mxu0 %v596_v14  ;;  %570 = vmatpush3.bf16.msra.mxu1 %v610_v23 }
  0x23   :  { %543 = vmatprep.mubr.bf16.mxu0 %v597_v15 }
  0x2a   :  { %544 = vmatmul.mubr.bf16.gmra.mrb[4].mxu0 %v598_v17  ;;  %v482_v17 = vld [vmem:[%s771_s4] ss:$0 sm:$0xff] }
  0x2b   :  { %547 = vmatprep.mubr.bf16.mxu0 %v599_v18 }
  0x32   :  { %548 = vmatmul.mubr.bf16.gmra.mrb[8].mxu0 %v600_v19 }
  0x33   :  { %551 = vmatprep.mubr.bf16.mxu0 %v601_v20 }
  0x3a   :  { %552 = vmatmul.mubr.bf16.gmra.mrb[12].mxu0 %v602_v21 }
  0xf5   :  { %v541_v25 = vpop.f32.mrb[0].mxu0 }
  0xf6   :  { %v199_v26 = vadd.f32 %v541_v25, %v465_v24  ;;  %v190_v27 = vpop.f32.mrb[1].mxu0 }
  0xf7   :  { %v191_v28 = vadd.f32 %v465_v24, %v190_v27  ;;  %v542_v29 = vpop.f32.mrb[2].mxu0 }
  0xf8   :  { %v202_v30 = vadd.f32 %v542_v29, %v465_v24  ;;  %v193_v31 = vpop.f32.mrb[3].mxu0  ;;  %v255_v33 = vmax.f32 %v199_v26, 0.0 }
  0xf9   :  { %v194_v32 = vadd.f32 %v465_v24, %v193_v31  ;;  %v253_v35 = vmax.f32 %v191_v28, 0.0 }
  0xfa   :  { %v256_v34 = vmax.f32 %v202_v30, 0.0 }
  0xfb   :  { %v254_v36 = vmax.f32 %v194_v32, 0.0 }
  0xfc   :  { %v270_v37 = vpack.c.bf16 %v256_v34, %v255_v33 }
  0xfd   :  { %v545_v38 = vpop.f32.mrb[4].mxu0  ;;  %v269_v39 = vpack.c.bf16 %v254_v36, %v253_v35 }
  0xfe   :  { %v215_v40 = vadd.f32 %v545_v38, %v465_v24  ;;  %v206_v41 = vpop.f32.mrb[5].mxu0 }
  0xff   :  { %v207_v42 = vadd.f32 %v465_v24, %v206_v41  ;;  %v546_v43 = vpop.f32.mrb[6].mxu0  ;;  %571 = vmatprep.mubr.bf16.mxu1 %v269_v39 }
 0x100   :  { %v218_v44 = vadd.f32 %v546_v43, %v465_v24  ;;  %v209_v45 = vpop.f32.mrb[7].mxu0  ;;  %572 = vmatmul.mubr.bf16.vlgmr.msra.gmra.mrb[0].mxu1 %v270_v37  ;;  %v259_v47 = vmax.f32 %v215_v40, 0.0 }
 0x101   :  { %v210_v46 = vadd.f32 %v465_v24, %v209_v45  ;;  %v257_v49 = vmax.f32 %v207_v42, 0.0 }
 0x102   :  { %v260_v48 = vmax.f32 %v218_v44, 0.0 }
 0x103   :  { %v258_v50 = vmax.f32 %v210_v46, 0.0 }
 0x104   :  { %v272_v51 = vpack.c.bf16 %v260_v48, %v259_v47 }
 0x105   :  { %v271_v52 = vpack.c.bf16 %v258_v50, %v257_v49  ;;  %v549_v53 = vpop.f32.mrb[8].mxu0 }
 0x106   :  { %v231_v54 = vadd.f32 %v549_v53, %v465_v24  ;;  %v222_v55 = vpop.f32.mrb[9].mxu0 }
 0x107   :  { %v223_v56 = vadd.f32 %v465_v24, %v222_v55  ;;  %v550_v57 = vpop.f32.mrb[10].mxu0  ;;  %575 = vmatprep.mubr.bf16.mxu1 %v271_v52 }
 0x108   :  { %v234_v58 = vadd.f32 %v550_v57, %v465_v24  ;;  %v225_v59 = vpop.f32.mrb[11].mxu0  ;;  %576 = vmatmul.mubr.bf16.gmra.mrb[4].mxu1 %v272_v51  ;;  %v263_v61 = vmax.f32 %v231_v54, 0.0 }
 0x109   :  { %v226_v60 = vadd.f32 %v465_v24, %v225_v59  ;;  %v261_v63 = vmax.f32 %v223_v56, 0.0 }
 0x10a   :  { %v264_v62 = vmax.f32 %v234_v58, 0.0 }
 0x10b   :  { %v262_v0 = vmax.f32 %v226_v60, 0.0 }
 0x10c   :  { %v274_v1 = vpack.c.bf16 %v264_v62, %v263_v61 }
 0x10d   :  { %v273_v2 = vpack.c.bf16 %v262_v0, %v261_v63  ;;  %v553_v3 = vpop.f32.mrb[12].mxu0 }
 0x10e   :  { %v247_v4 = vadd.f32 %v553_v3, %v465_v24  ;;  %v238_v5 = vpop.f32.mrb[13].mxu0 }
 0x10f   :  { %v239_v6 = vadd.f32 %v465_v24, %v238_v5  ;;  %v554_v7 = vpop.f32.mrb[14].mxu0  ;;  %579 = vmatprep.mubr.bf16.mxu1 %v273_v2 }
 0x110   :  { %v250_v8 = vadd.f32 %v554_v7, %v465_v24  ;;  %v241_v9 = vpop.f32.mrb[15].mxu0  ;;  %580 = vmatmul.mubr.bf16.gmra.mrb[8].mxu1 %v274_v1  ;;  %v267_v11 = vmax.f32 %v247_v4, 0.0 }
 0x111   :  { %v242_v10 = vadd.f32 %v465_v24, %v241_v9  ;;  %v265_v13 = vmax.f32 %v239_v6, 0.0 }
 0x112   :  { %v268_v12 = vmax.f32 %v250_v8, 0.0 }
 0x113   :  { %v266_v14 = vmax.f32 %v242_v10, 0.0 }
 0x114   :  { %v276_v15 = vpack.c.bf16 %v268_v12, %v267_v11 }
 0x115   :  { %v275_v16 = vpack.c.bf16 %v266_v14, %v265_v13 }
 0x117   :  { %583 = vmatprep.mubr.bf16.mxu1 %v275_v16 }
 0x118   :  { %584 = vmatmul.mubr.bf16.gmra.mrb[12].mxu1 %v276_v15 }
 0x1d3   :  { %v573_v18 = vpop.f32.mrb[0].mxu1 }
 0x1d4   :  { %v391_v19 = vadd.f32 %v573_v18, %v482_v17  ;;  %v382_v20 = vpop.f32.mrb[1].mxu1 }
 0x1d5   :  { %v383_v21 = vadd.f32 %v482_v17, %v382_v20  ;;  %v574_v22 = vpop.f32.mrb[2].mxu1 }
 0x1d6   :  { %447 = vst [vmem:[%s772_s5 + $0x10] sm:$0xff] %v391_v19  ;;  %v394_v23 = vadd.f32 %v574_v22, %v482_v17  ;;  %v385_v24 = vpop.f32.mrb[3].mxu1 }
 0x1d7   :  { %445 = vst [vmem:[%s772_s5] sm:$0xff] %v383_v21  ;;  %v386_v25 = vadd.f32 %v482_v17, %v385_v24 }
 0x1d8   :  { %448 = vst [vmem:[%s772_s5 + $0x18] sm:$0xff] %v394_v23 }
 0x1d9   :  { %446 = vst [vmem:[%s772_s5 + $0x8] sm:$0xff] %v386_v25 }
 0x1db   :  { %v577_v26 = vpop.f32.mrb[4].mxu1 }
 0x1dc   :  { %v407_v27 = vadd.f32 %v577_v26, %v482_v17  ;;  %v398_v28 = vpop.f32.mrb[5].mxu1 }
 0x1dd   :  { %v399_v29 = vadd.f32 %v482_v17, %v398_v28  ;;  %v578_v30 = vpop.f32.mrb[6].mxu1 }
 0x1de   :  { %451 = vst [vmem:[%s772_s5 + $0x30] sm:$0xff] %v407_v27  ;;  %v410_v31 = vadd.f32 %v578_v30, %v482_v17  ;;  %v401_v32 = vpop.f32.mrb[7].mxu1 }
 0x1df   :  { %449 = vst [vmem:[%s772_s5 + $0x20] sm:$0xff] %v399_v29  ;;  %v402_v33 = vadd.f32 %v482_v17, %v401_v32 }
 0x1e0   :  { %452 = vst [vmem:[%s772_s5 + $0x38] sm:$0xff] %v410_v31 }
 0x1e1   :  { %450 = vst [vmem:[%s772_s5 + $0x28] sm:$0xff] %v402_v33 }
 0x1e3   :  { %v581_v34 = vpop.f32.mrb[8].mxu1 }
 0x1e4   :  { %v423_v35 = vadd.f32 %v581_v34, %v482_v17  ;;  %v414_v36 = vpop.f32.mrb[9].mxu1 }
 0x1e5   :  { %v415_v37 = vadd.f32 %v482_v17, %v414_v36  ;;  %v582_v38 = vpop.f32.mrb[10].mxu1 }
 0x1e6   :  { %455 = vst [vmem:[%s772_s5 + $0x50] sm:$0xff] %v423_v35  ;;  %v426_v39 = vadd.f32 %v582_v38, %v482_v17  ;;  %v417_v40 = vpop.f32.mrb[11].mxu1 }
 0x1e7   :  { %453 = vst [vmem:[%s772_s5 + $0x40] sm:$0xff] %v415_v37  ;;  %v418_v41 = vadd.f32 %v482_v17, %v417_v40 }
 0x1e8   :  { %456 = vst [vmem:[%s772_s5 + $0x58] sm:$0xff] %v426_v39 }
 0x1e9   :  { %454 = vst [vmem:[%s772_s5 + $0x48] sm:$0xff] %v418_v41 }
 0x1eb   :  { %v585_v42 = vpop.f32.mrb[12].mxu1 }
 0x1ec   :  { %v439_v43 = vadd.f32 %v585_v42, %v482_v17  ;;  %v430_v44 = vpop.f32.mrb[13].mxu1 }
 0x1ed   :  { %v431_v45 = vadd.f32 %v482_v17, %v430_v44  ;;  %v586_v46 = vpop.f32.mrb[14].mxu1 }
 0x1ee   :  { %459 = vst [vmem:[%s772_s5 + $0x70] sm:$0xff] %v439_v43  ;;  %v442_v47 = vadd.f32 %v586_v46, %v482_v17  ;;  %v433_v48 = vpop.f32.mrb[15].mxu1 }
 0x1ef   :  { %457 = vst [vmem:[%s772_s5 + $0x60] sm:$0xff] %v431_v45  ;;  %v434_v49 = vadd.f32 %v482_v17, %v433_v48 }
 0x1f0   :  { %460 = vst [vmem:[%s772_s5 + $0x78] sm:$0xff] %v442_v47 }
 0x1f1   :  { %458 = vst [vmem:[%s772_s5 + $0x68] sm:$0xff] %v434_v49 }

</bundles_post_ra>
